<compile_context>
chip_gen: v6e
topology: v6e:2x2x1
jax: 0.10.0
libtpu: 0.0.40
codegen_flags: <defaults>
</compile_context>

<pallas_src>
import numpy as np
import jax
import jax.numpy as jnp
from jax.experimental import pallas as pl
from jax.experimental.pallas import tpu as pltpu

# ---------------- problem sizes (small, consistent with the module) ----------
B = 16          # n_ent
R = 32          # rank (= d_model)
N_HEAD = 4
D_K = R // N_HEAD
L = 8           # number of history embeddings


# ---------------------------------------------------------------------------
# One-time parameter preprocessing (runs ONCE at setup, never per forward call).
# ---------------------------------------------------------------------------
def prepare_params(params, n_head):
    """Fold scales / projections and pack everything into two slabs."""
    wq, wk, wv = params["wq"], params["wk"], params["wv"]
    wfc, bfc = params["wfc"], params["bfc"]
    w1, b1 = params["w1"], params["b1"]
    w2, b2 = params["w2"], params["b2"]
    r = wq.shape[0]
    d_k = r // n_head

    # Fold 1/temperature into Wq; fold 2*W1 into the q-side projection.
    wq_scaled = wq * np.float32(1.0 / np.sqrt(d_k))
    w_qext = jnp.concatenate([wq_scaled, 2.0 * w1], axis=1)      # (R, 2R): [Wq' | 2*W1]
    w_kv = jnp.concatenate([wk, wv], axis=1)                     # (R, 2R): [Wk  | Wv ]

    # Block-diagonal per-head ones mask, replicated onto BOTH lane halves so the
    # per-head score lands lane-aligned with V inside the fused [K|V] activation.
    head = np.arange(r) // d_k
    hm = (head[:, None] == head[None, :]).astype(np.float32)     # (R, R)
    hmask_wide = jnp.asarray(np.concatenate([hm, hm], axis=1))   # (R, 2R)

    # Fold the MHA output projection (fc) into fc1.
    w_a = wfc @ w1                                               # (R, R)
    b_fold = bfc @ w1 + b1                                       # (1, R)

    w_slab = jnp.concatenate([w_kv, w_qext, hmask_wide, w_a, w2], axis=1)  # (R, 8R)
    b_slab = jnp.concatenate([b_fold, b2], axis=1)                          # (1, 2R)
    return w_slab.astype(jnp.float32), b_slab.astype(jnp.float32)


# ---------------------------------------------------------------------------
# Kernel
# ---------------------------------------------------------------------------
def _sym_attn_kernel(q_ref, k_ref, w_ref, b_ref, out_ref):
    b, r = q_ref.shape
    bl = k_ref.shape[0]
    l = bl // b
    r2 = 2 * r

    q = q_ref[...]                       # (B, R)
    k2 = k_ref[...]                      # (B*L, R)

    # Static windows into the packed slabs (compile-time-constant slices).
    w_kv   = w_ref[:, 0:r2]                      # [Wk | Wv]             (R, 2R)
    w_qext = w_ref[:, r2:2 * r2]                 # [Wq/sqrt(dk) | 2*W1]  (R, 2R)
    hmask  = w_ref[:, 2 * r2:3 * r2]             # per-head seg-sum mask (R, 2R)
    w_a    = w_ref[:, 3 * r2:3 * r2 + r]         # Wfc @ W1              (R, R)
    w_o    = w_ref[:, 3 * r2 + r:3 * r2 + r2]    # W2                    (R, R)
    b_fold = b_ref[:, 0:r]                       # bfc @ W1 + b1         (1, R)
    b_o    = b_ref[:, r:r2]                      # b2                    (1, R)

    # --- fused projections: two independent MXU matmuls at the head of the chain
    kv = jnp.dot(k2, w_kv, preferred_element_type=jnp.float32)    # (B*L, 2R) = [K | V]
    qp = jnp.dot(q, w_qext, preferred_element_type=jnp.float32)   # (B, 2R)   = [Q' | q@2W1]

    # L == 8 rows per batch aligns exactly with the sublane tile -> reshape is a no-op.
    kv3 = kv.reshape(b, l, r2)                                    # (B, L, 2R)
    k3 = kv3[..., :r]                                             # K lives in low lanes
    qk = qp[:, None, :r] * k3                                     # (B, L, R)

    # Per-head segment-sum: sums Q.K within each head AND broadcasts the score to
    # both lane halves, so attn is already lane-aligned with V inside kv3 (no
    # cross-lane slice of V needed).  Scale 1/sqrt(d_k) is pre-folded into Wq.
    scores = jnp.dot(qk.reshape(bl, r), hmask,
                     preferred_element_type=jnp.float32).reshape(b, l, r2)
    m = jnp.max(scores, axis=1, keepdims=True)                    # (B, 1, 2R)
    e = jnp.exp(scores - m)
    den = jnp.sum(e, axis=1, keepdims=True)
    rinv = pl.reciprocal(den, approx=True)                        # EUP slot (free)
    rinv = rinv * (2.0 - den * rinv)                              # Newton -> full f32
    attn = e * rinv                                               # (B, L, 2R)

    hcat = jnp.sum(attn * kv3, axis=1)                            # (B, 2R)
    heads = hcat[:, r:]                                           # concat of head outputs

    # fc + residuals folded into fc1:
    #   x @ W1 + b1 == heads@(Wfc@W1) + q@(2*W1) + (bfc@W1 + b1)
    h1 = jnp.dot(heads, w_a, preferred_element_type=jnp.float32) + qp[:, r:] + b_fold
    h1 = jnp.maximum(h1, 0.0)                                     # relu
    out = jnp.dot(h1, w_o, preferred_element_type=jnp.float32) + b_o
    out_ref[...] = out.astype(out_ref.dtype)


_VMEM_SPEC = pl.BlockSpec(memory_space=pltpu.MemorySpace.VMEM)


@jax.jit
def symmetric_attn_forward(q_emb, k_hist, w_slab, b_slab):
    """q_emb: (B, R); k_hist: (B, L, R); slabs from prepare_params()."""
    b, r = q_emb.shape
    k_flat = k_hist.reshape(-1, r)       # contiguous reshape: metadata-only under jit
    return pl.pallas_call(
        _sym_attn_kernel,
        out_shape=jax.ShapeDtypeStruct((b, r), jnp.float32),
        in_specs=[_VMEM_SPEC, _VMEM_SPEC, _VMEM_SPEC, _VMEM_SPEC],
        out_specs=_VMEM_SPEC,
    )(q_emb, k_flat, w_slab, b_slab)


# ---------------------------------------------------------------------------
# Pure-JAX reference (matches the PyTorch module; dropout=0, no layer norm)
# ---------------------------------------------------------------------------
def reference_forward(q_emb, k_hist, params, n_head):
    b, r = q_emb.shape
    _, l, _ = k_hist.shape
    d_k = r // n_head
    Q = q_emb @ params["wq"]
    K = (k_hist.reshape(b * l, r) @ params["wk"]).reshape(b, l, r)
    V = (k_hist.reshape(b * l, r) @ params["wv"]).reshape(b, l, r)
    Qh = Q.reshape(b, n_head, d_k)
    Kh = K.reshape(b, l, n_head, d_k)
    Vh = V.reshape(b, l, n_head, d_k)
    scores = jnp.einsum("bhd,blhd->bhl", Qh, Kh) / np.power(d_k, 0.5)
    attn = jax.nn.softmax(scores, axis=-1)
    heads = jnp.einsum("bhl,blhd->bhd", attn, Vh).reshape(b, r)
    mha = heads @ params["wfc"] + params["bfc"] + q_emb
    x = mha + q_emb
    h1 = jax.nn.relu(x @ params["w1"] + params["b1"])
    return h1 @ params["w2"] + params["b2"]


def _xavier_normal(key, shape):
    fan_out, fan_in = shape  # torch Linear weight is (out, in)
    std = np.sqrt(2.0 / (fan_in + fan_out))
    return jax.random.normal(key, shape, jnp.float32) * std


if __name__ == "__main__":
    key = jax.random.PRNGKey(0)
    keys = jax.random.split(key, 12)

    # Deterministic parameter init (shapes follow the module's __init__).
    # torch Linear weights are (out, in); transposed to (in, out) so y = x @ W.
    std_qk = np.sqrt(2.0 / (R + D_K))
    wq = (jax.random.normal(keys[0], (R, R), jnp.float32) * std_qk).T
    wk = (jax.random.normal(keys[1], (R, R), jnp.float32) * std_qk).T
    wv = (jax.random.normal(keys[2], (R, R), jnp.float32) * std_qk).T
    wfc = _xavier_normal(keys[3], (R, R)).T
    bfc = jax.random.normal(keys[4], (1, R), jnp.float32) * 0.01
    w1 = _xavier_normal(keys[5], (R, R)).T
    b1 = jax.random.normal(keys[6], (1, R), jnp.float32) * 0.01
    w2 = _xavier_normal(keys[7], (R, R)).T
    b2 = jax.random.normal(keys[8], (1, R), jnp.float32) * 0.01

    params = dict(wq=wq, wk=wk, wv=wv, wfc=wfc, bfc=bfc,
                  w1=w1, b1=b1, w2=w2, b2=b2)

    # One-time packing / folding (NOT per forward call).
    w_slab, b_slab = prepare_params(params, N_HEAD)

    # init_emb.weight -> q ; history embeddings (list of L tensors) -> k = v
    q_emb = jax.random.normal(keys[9], (B, R), jnp.float32)
    k_hist = jax.random.normal(keys[10], (B, L, R), jnp.float32)

    out = symmetric_attn_forward(q_emb, k_hist, w_slab, b_slab)
    out = jax.block_until_ready(out)

    ref = reference_forward(q_emb, k_hist, params, N_HEAD)
    np.testing.assert_allclose(np.asarray(out), np.asarray(ref),
                               rtol=1e-5, atol=1e-5)
    print("KERNEL_OK")
</pallas_src>

<mosaic_0001>
module attributes {stable_mosaic.version = 11 : i64} {
  func.func @_sym_attn_kernel(%arg0: memref<16x32xf32, #tpu.memory_space<vmem>>, %arg1: memref<128x32xf32, #tpu.memory_space<vmem>>, %arg2: memref<32x256xf32, #tpu.memory_space<vmem>>, %arg3: memref<1x64xf32, #tpu.memory_space<vmem>>, %arg4: memref<16x32xf32, #tpu.memory_space<vmem>>) attributes {dimension_semantics = [], scalar_prefetch = 0 : i64, scratch_operands = 0 : i64, tpu.core_type = #tpu.core_type<tc>} {
    %c0 = arith.constant 0 : index
    %c0_0 = arith.constant 0 : index
    %0 = vector.load %arg0[%c0, %c0_0] : memref<16x32xf32, #tpu.memory_space<vmem>>, vector<16x32xf32>
    %c0_1 = arith.constant 0 : index
    %c0_2 = arith.constant 0 : index
    %1 = vector.load %arg1[%c0_1, %c0_2] : memref<128x32xf32, #tpu.memory_space<vmem>>, vector<128x32xf32>
    %c0_3 = arith.constant 0 : index
    %c0_4 = arith.constant 0 : index
    %2 = vector.load %arg2[%c0_3, %c0_4] : memref<32x256xf32, #tpu.memory_space<vmem>>, vector<32x64xf32>
    %c0_5 = arith.constant 0 : index
    %c64 = arith.constant 64 : index
    %3 = vector.load %arg2[%c0_5, %c64] : memref<32x256xf32, #tpu.memory_space<vmem>>, vector<32x64xf32>
    %c0_6 = arith.constant 0 : index
    %c128 = arith.constant 128 : index
    %4 = vector.load %arg2[%c0_6, %c128] : memref<32x256xf32, #tpu.memory_space<vmem>>, vector<32x64xf32>
    %c0_7 = arith.constant 0 : index
    %c192 = arith.constant 192 : index
    %5 = vector.load %arg2[%c0_7, %c192] : memref<32x256xf32, #tpu.memory_space<vmem>>, vector<32x32xf32>
    %c0_8 = arith.constant 0 : index
    %c224 = arith.constant 224 : index
    %6 = vector.load %arg2[%c0_8, %c224] : memref<32x256xf32, #tpu.memory_space<vmem>>, vector<32x32xf32>
    %c0_9 = arith.constant 0 : index
    %c0_10 = arith.constant 0 : index
    %7 = vector.load %arg3[%c0_9, %c0_10] : memref<1x64xf32, #tpu.memory_space<vmem>>, vector<1x32xf32>
    %c0_11 = arith.constant 0 : index
    %c32 = arith.constant 32 : index
    %8 = vector.load %arg3[%c0_11, %c32] : memref<1x64xf32, #tpu.memory_space<vmem>>, vector<1x32xf32>
    %cst = arith.constant dense<0.000000e+00> : vector<128x64xf32>
    %9 = tpu.matmul %1, %2, %cst {dimension_numbers = #tpu.dot_dimension_numbers<[1], [0], [0], [1], [0, 0, 1, 1], [], []>} : vector<128x32xf32>, vector<32x64xf32>, vector<128x64xf32> -> vector<128x64xf32>
    %cst_12 = arith.constant dense<0.000000e+00> : vector<16x64xf32>
    %10 = tpu.matmul %0, %3, %cst_12 {dimension_numbers = #tpu.dot_dimension_numbers<[1], [0], [0], [1], [0, 0, 1, 1], [], []>} : vector<16x32xf32>, vector<32x64xf32>, vector<16x64xf32> -> vector<16x64xf32>
    %11 = vector.shape_cast %9 : vector<128x64xf32> to vector<16x8x64xf32>
    %12 = vector.extract_strided_slice %11 {offsets = [0, 0, 0], sizes = [16, 8, 32], strides = [1, 1, 1]} : vector<16x8x64xf32> to vector<16x8x32xf32>
    %13 = vector.extract_strided_slice %10 {offsets = [0, 0], sizes = [16, 32], strides = [1, 1]} : vector<16x64xf32> to vector<16x32xf32>
    %14 = vector.shape_cast %13 : vector<16x32xf32> to vector<16x1x32xf32>
    %15 = vector.broadcast %14 : vector<16x1x32xf32> to vector<16x8x32xf32>
    %16 = arith.mulf %15, %12 : vector<16x8x32xf32>
    %17 = vector.shape_cast %16 : vector<16x8x32xf32> to vector<128x32xf32>
    %cst_13 = arith.constant dense<0.000000e+00> : vector<128x64xf32>
    %18 = tpu.matmul %17, %4, %cst_13 {dimension_numbers = #tpu.dot_dimension_numbers<[1], [0], [0], [1], [0, 0, 1, 1], [], []>} : vector<128x32xf32>, vector<32x64xf32>, vector<128x64xf32> -> vector<128x64xf32>
    %19 = vector.shape_cast %18 : vector<128x64xf32> to vector<16x8x64xf32>
    %cst_14 = arith.constant dense<0xFF800000> : vector<16x64xf32>
    %20 = vector.multi_reduction <maximumf>, %19, %cst_14 [1] : vector<16x8x64xf32> to vector<16x64xf32>
    %21 = vector.shape_cast %20 : vector<16x64xf32> to vector<16x1x64xf32>
    %22 = vector.broadcast %21 : vector<16x1x64xf32> to vector<16x8x64xf32>
    %23 = arith.subf %19, %22 : vector<16x8x64xf32>
    %24 = math.exp %23 : vector<16x8x64xf32>
    %cst_15 = arith.constant dense<0.000000e+00> : vector<16x64xf32>
    %25 = vector.multi_reduction <add>, %24, %cst_15 [1] : vector<16x8x64xf32> to vector<16x64xf32>
    %26 = vector.shape_cast %25 : vector<16x64xf32> to vector<16x1x64xf32>
    %27 = tpu.reciprocal %26 {approx = true} : vector<16x1x64xf32> -> vector<16x1x64xf32>
    %28 = arith.mulf %26, %27 : vector<16x1x64xf32>
    %cst_16 = arith.constant 2.000000e+00 : f32
    %29 = vector.broadcast %cst_16 : f32 to vector<16x1x64xf32>
    %30 = arith.subf %29, %28 : vector<16x1x64xf32>
    %31 = arith.mulf %27, %30 : vector<16x1x64xf32>
    %32 = vector.broadcast %31 : vector<16x1x64xf32> to vector<16x8x64xf32>
    %33 = arith.mulf %24, %32 : vector<16x8x64xf32>
    %34 = arith.mulf %33, %11 : vector<16x8x64xf32>
    %cst_17 = arith.constant dense<0.000000e+00> : vector<16x64xf32>
    %35 = vector.multi_reduction <add>, %34, %cst_17 [1] : vector<16x8x64xf32> to vector<16x64xf32>
    %36 = vector.extract_strided_slice %35 {offsets = [0, 32], sizes = [16, 32], strides = [1, 1]} : vector<16x64xf32> to vector<16x32xf32>
    %cst_18 = arith.constant dense<0.000000e+00> : vector<16x32xf32>
    %37 = tpu.matmul %36, %5, %cst_18 {dimension_numbers = #tpu.dot_dimension_numbers<[1], [0], [0], [1], [0, 0, 1, 1], [], []>} : vector<16x32xf32>, vector<32x32xf32>, vector<16x32xf32> -> vector<16x32xf32>
    %38 = vector.extract_strided_slice %10 {offsets = [0, 32], sizes = [16, 32], strides = [1, 1]} : vector<16x64xf32> to vector<16x32xf32>
    %39 = arith.addf %37, %38 : vector<16x32xf32>
    %40 = vector.broadcast %7 : vector<1x32xf32> to vector<16x32xf32>
    %41 = arith.addf %39, %40 : vector<16x32xf32>
    %cst_19 = arith.constant 0.000000e+00 : f32
    %42 = vector.broadcast %cst_19 : f32 to vector<16x32xf32>
    %43 = arith.maximumf %41, %42 : vector<16x32xf32>
    %cst_20 = arith.constant dense<0.000000e+00> : vector<16x32xf32>
    %44 = tpu.matmul %43, %6, %cst_20 {dimension_numbers = #tpu.dot_dimension_numbers<[1], [0], [0], [1], [0, 0, 1, 1], [], []>} : vector<16x32xf32>, vector<32x32xf32>, vector<16x32xf32> -> vector<16x32xf32>
    %45 = vector.broadcast %8 : vector<1x32xf32> to vector<16x32xf32>
    %46 = arith.addf %44, %45 : vector<16x32xf32>
    %c0_21 = arith.constant 0 : index
    %c0_22 = arith.constant 0 : index
    %47 = vector.load %arg4[%c0_21, %c0_22] : memref<16x32xf32, #tpu.memory_space<vmem>>, vector<16x32xf32>
    tpu.vector_store %arg4[%c0_21, %c0_22], %46 {strides = array<i32>} : memref<16x32xf32, #tpu.memory_space<vmem>>, vector<16x32xf32>,
    return
  }
}

</mosaic_0001>

<bundles_post_ra>
// kernel: symmetric_attn_forward.1
= control target key start
LH: loop header
LB: loop body
LE: loop exit
PB: predicated region body
PF: predicated region fallthrough
CT: control target
= control target key end

     0   :  { %9 = vsyncpa [#allocation3], 0  ;;  %s2318_s0 = inlined_call_operand.hbm [shape: f32[16,32], index: 0, kind: input, shape index: {}]   ;;  %s2319_s1 = inlined_call_operand.hbm [shape: f32[128,32], index: 1, kind: input, shape index: {}]   ;;  %s2320_s2 = inlined_call_operand.hbm [shape: f32[32,256], index: 2, kind: input, shape index: {}]   ;;  %s2321_s3 = inlined_call_operand.vmem [shape: f32[1,64], index: 3, kind: input, shape index: {}]   ;;  %s2322_s4 = inlined_call_operand.hbm [shape: f32[16,32], index: 4, kind: output, shape index: {}]  }
   0x1   :  { %10 = vsyncpa [#allocation6], 0 }
   0x2   :  { %11 = vsyncpa [#allocation4], 0  ;;  %s1875_s15 = smov [#allocation5]   ;;  %s1876_s17 = smov [#allocation2]  }
   0x3   :  { %s29_s16 = sshll.u32 %s1875_s15, 4  ;;  %s17_s18 = sshll.u32 %s1876_s17, 4  ;;  %s30_s16 = int_to_ptr.vmem [resolvable:$true] %s29_s16  ;;  %s18_s18 = int_to_ptr.vmem [resolvable:$true] %s17_s18 }
   0x4   :  { %s1797_s19 = scalar_lea.vmem %s30_s16, 2048  ;;  %p1802_p1 = scmp.lt.s32.totalorder %s30_s16, %s30_s16 }
   0x5   :  { %p1798_p0 = scmp.ne.s32.totalorder %s30_s16, %s1797_s19  ;;  %p1803_p2 = scmp.lt.s32.totalorder %s1797_s19, %s1797_s19 }
   0x7   :  { %p1804_p3 = por %p1803_p2, %p1802_p1 }
   0x9   :  { %p1805_p4 = pnand %p1804_p3, %p1798_p0 }
   0xb   :  { %1808 = shalt.err (!%p1805_p4)
}
   0xc   :  { %s1877_s20 = smov 128   ;;  %s1878_s21 = smov 8  }
   0xd   :  { %35 = dma.hbm_to_vmem [thread:$0]  %s2319_s1, 2048, %s30_s16, [#allocation6], %s1877_s20, %s1877_s20, %s1878_s21  }
   0xe   :  { %s1817_s24 = scalar_lea.vmem %s18_s18, 256  ;;  %p1822_p6 = scmp.lt.s32.totalorder %s18_s18, %s18_s18 }
   0xf   :  { %p1818_p5 = scmp.ne.s32.totalorder %s18_s18, %s1817_s24  ;;  %p1823_p7 = scmp.lt.s32.totalorder %s1817_s24, %s1817_s24 }
  0x11   :  { %p1824_p8 = por %p1823_p7, %p1822_p6 }
  0x13   :  { %p1825_p9 = pnand %p1824_p8, %p1818_p5 }
  0x15   :  { %1828 = shalt.err (!%p1825_p9)
}
  0x16   :  { %23 = dma.hbm_to_vmem [thread:$0]  %s2318_s0, 256, %s18_s18, [#allocation3], %s1877_s20, %s1877_s20, %s1878_s21  }
  0x17   :  { %s1879_s27 = smov [#allocation7]  }
  0x18   :  { %s41_s28 = sshll.u32 %s1879_s27, 4  ;;  %s42_s28 = int_to_ptr.vmem [resolvable:$true] %s41_s28 }
  0x19   :  { %s1837_s29 = scalar_lea.vmem %s42_s28, 1024  ;;  %p1842_p11 = scmp.lt.s32.totalorder %s42_s28, %s42_s28 }
  0x1a   :  { %p1838_p10 = scmp.ne.s32.totalorder %s42_s28, %s1837_s29  ;;  %p1843_p12 = scmp.lt.s32.totalorder %s1837_s29, %s1837_s29 }
  0x1c   :  { %p1844_p13 = por %p1843_p12, %p1842_p11 }
  0x1e   :  { %p1845_p0 = pnand %p1844_p13, %p1838_p10 }
  0x20   :  { %1848 = shalt.err (!%p1845_p0)
}
  0x21   :  { %s1880_s1 = smov 256   ;;  %s1881_s30 = smov 16  }
  0x22   :  { %47 = dma.hbm_to_vmem [thread:$0]  %s2320_s2, 1024, %s42_s28, [#allocation6], %s1880_s1, %s1880_s1, %s1881_s30  }
  0x23   :  { %1869 = dma.done.wait [#allocation3], 256  }
  0x24   :  { %1870 = vsyncadd [#allocation3], 4294967040 }
  0x25   :  { %1871 = dma.done.wait [#allocation6], 3072  }
  0x26   :  { %1872 = vsyncadd [#allocation6], 4294964224  ;;  %vm86_vm0 = vcmask 261120   ;;  %v80_v0 = vld [vmem:[#allocation7 + $0x30] sm:$0xff]  ;;  %s1882_s0 = smov 64   ;;  %v61_v2 = vld [vmem:[#allocation5] sm:$0xff]  ;;  %v383_v37 = vlaneseq }
  0x27   :  { %v78_v1 = vld [vmem:[#allocation7 + $0x10] sm:$0xff]  ;;  %290 = vrot.lane.b32.xlu0 %v80_v0, %s1882_s0  ;;  %v79_v3 = vld [vmem:[#allocation7 + $0x20] sm:$0xff]  ;;  %1612 = vmatprep.subr.mxu0 %v80_v0  ;;  %v62_v6 = vld [vmem:[#allocation5 + $0x8] sm:$0xff]  ;;  %v1883_v35 = vmov 1966171168   ;;  %vm766_vm1 = vcmask 523264  }
  0x28   :  { %286 = vrot.lane.b32.xlu1 %v78_v1, %s1882_s0  ;;  %v77_v4 = vld [vmem:[#allocation7] sm:$0xff]  ;;  %1620 = vmatprep.mubr.msk.f32.mxu0 %vm86_vm0, %v61_v2  ;;  %v59_v5 = vld [vmem:[#allocation2] sm:$0xff]  ;;  %v64_v8 = vld [vmem:[#allocation5 + $0x18] sm:$0xff]  ;;  %v381_v36 = vunpack.c.l.s4 %v1883_v35  ;;  %v384_v40 = vshrl.u32 %v383_v37, 7  ;;  %vm1263_vm2 = vcmask 1041409   ;;  %vm1265_vm3 = vcmask 1042434  }
  0x29   :  { %1613 = vmatpush3.msra.mxu0 %v80_v0  ;;  %1652 = vmatprep.mubr.msk.f32.mxu1 %vm86_vm0, %v59_v5  ;;  %v63_v7 = vld [vmem:[#allocation5 + $0x10] sm:$0xff]  ;;  %v65_v9 = vld [vmem:[#allocation5 + $0x20] sm:$0xff]  ;;  %v66_v10 = vld [vmem:[#allocation5 + $0x28] sm:$0xff]  ;;  %vm1267_vm4 = vcmask 1043459   ;;  %vm1269_vm5 = vcmask 1044484   ;;  %vm1271_vm6 = vcmask 1045509  }
  0x2a   :  { %1614 = vmatprep.subr.mxu0 %v79_v3  ;;  %v67_v11 = vld [vmem:[#allocation5 + $0x30] sm:$0xff]  ;;  %v68_v12 = vld [vmem:[#allocation5 + $0x38] sm:$0xff]  ;;  %v69_v13 = vld [vmem:[#allocation5 + $0x40] sm:$0xff]  ;;  %v382_v39 = vunpack.c.0.s8 %v381_v36  ;;  %v1978_v52 = vsub.s32 0, %v384_v40  ;;  %vm1273_vm7 = vcmask 1046534   ;;  %vm1275_vm8 = vcmask 1047559  }
  0x2b   :  { %288 = vrot.lane.b32.xlu0 %v79_v3, %s1882_s0  ;;  %1615 = vmatpush3.msra.mxu0 %v79_v3  ;;  %v70_v14 = vld [vmem:[#allocation5 + $0x48] sm:$0xff]  ;;  %v71_v15 = vld [vmem:[#allocation5 + $0x50] sm:$0xff]  ;;  %v72_v16 = vld [vmem:[#allocation5 + $0x58] sm:$0xff]  ;;  %s1884_s2 = smov 96   ;;  %s1885_s7 = smov 32  }
  0x2c   :  { %284 = vrot.lane.b32.xlu1 %v77_v4, %s1882_s0  ;;  %1616 = vmatprep.subr.mxu0 %v78_v1  ;;  %v73_v17 = vld [vmem:[#allocation5 + $0x60] sm:$0xff]  ;;  %v74_v18 = vld [vmem:[#allocation5 + $0x68] sm:$0xff]  ;;  %v75_v19 = vld [vmem:[#allocation5 + $0x70] sm:$0xff]  ;;  %v385_v43 = vsub.s32 %v382_v39, %v384_v40 }
  0x2d   :  { %1617 = vmatpush3.msra.mxu0 %v78_v1  ;;  %v76_v20 = vld [vmem:[#allocation5 + $0x78] sm:$0xff]  ;;  %v83_v27 = vld [vmem:[#allocation7 + $0x28] sm:$0xff] }
  0x2e   :  { %1618 = vmatprep.subr.mxu0 %v77_v4  ;;  %v60_v25 = vld [vmem:[#allocation2 + $0x8] sm:$0xff]  ;;  %v81_v29 = vld [vmem:[#allocation7 + $0x8] sm:$0xff] }
  0x2f   :  { %1619 = vmatpush3.msra.mxu0 %v77_v4  ;;  %v84_v26 = vld [vmem:[#allocation7 + $0x38] sm:$0xff] }
  0x30   :  { %1621 = vmatmul.mubr.msk.f32.vlgmr.msra.gmra.mxu0 %vm86_vm0, %v62_v6  ;;  %1298 = vrot.lane.b32.xlu0 %v84_v26, %s1882_s0  ;;  %v82_v28 = vld [vmem:[#allocation7 + $0x18] sm:$0xff] }
  0x31   :  { %1623 = vmatprep.mubr.msk.f32.mxu0 %vm86_vm0, %v63_v7  ;;  %1296 = vrot.lane.b32.xlu1 %v83_v27, %s1882_s0 }
  0x34   :  { %1624 = vmatmul.mubr.msk.f32.gmra.mxu0 %vm86_vm0, %v64_v8  ;;  %1294 = vrot.lane.b32.xlu0 %v82_v28, %s1882_s0 }
  0x35   :  { %1626 = vmatprep.mubr.msk.f32.mxu0 %vm86_vm0, %v65_v9  ;;  %1292 = vrot.lane.b32.xlu1 %v81_v29, %s1882_s0 }
  0x38   :  { %1627 = vmatmul.mubr.msk.f32.gmra.mxu0 %vm86_vm0, %v66_v10 }
  0x39   :  { %1629 = vmatprep.mubr.msk.f32.mxu0 %vm86_vm0, %v67_v11 }
  0x3c   :  { %1630 = vmatmul.mubr.msk.f32.gmra.mxu0 %vm86_vm0, %v68_v12 }
  0x3d   :  { %1632 = vmatprep.mubr.msk.f32.mxu0 %vm86_vm0, %v69_v13 }
  0x40   :  { %1633 = vmatmul.mubr.msk.f32.gmra.mxu0 %vm86_vm0, %v70_v14 }
  0x41   :  { %1635 = vmatprep.mubr.msk.f32.mxu0 %vm86_vm0, %v71_v15 }
  0x44   :  { %1636 = vmatmul.mubr.msk.f32.gmra.mxu0 %vm86_vm0, %v72_v16 }
  0x45   :  { %1638 = vmatprep.mubr.msk.f32.mxu0 %vm86_vm0, %v73_v17 }
  0x48   :  { %1639 = vmatmul.mubr.msk.f32.gmra.mxu0 %vm86_vm0, %v74_v18 }
  0x49   :  { %1641 = vmatprep.mubr.msk.f32.mxu0 %vm86_vm0, %v75_v19 }
  0x4c   :  { %1642 = vmatmul.mubr.msk.f32.gmra.mxu0 %vm86_vm0, %v76_v20 }
  0x99   :  { %v291_v21 = vpop.permute.xlu0 %290 }
  0x9a   :  { %v287_v22 = vpop.permute.xlu1 %286  ;;  %1644 = vmatprep.subr.mxu1 %v291_v21 }
  0x9b   :  { %1645 = vmatpush3.msra.mxu1 %v291_v21 }
  0x9d   :  { %v289_v23 = vpop.permute.xlu0 %288 }
  0x9e   :  { %1646 = vmatprep.subr.mxu1 %v289_v23  ;;  %v285_v24 = vpop.permute.xlu1 %284 }
  0x9f   :  { %1647 = vmatpush3.msra.mxu1 %v289_v23 }
  0xa0   :  { %1648 = vmatprep.subr.mxu1 %v287_v22 }
  0xa1   :  { %1649 = vmatpush3.msra.mxu1 %v287_v22 }
  0xa2   :  { %1650 = vmatprep.subr.mxu1 %v285_v24 }
  0xa3   :  { %1651 = vmatpush3.msra.mxu1 %v285_v24 }
  0xa4   :  { %1653 = vmatmul.mubr.msk.f32.vlgmr.msra.gmra.mxu1 %vm86_vm0, %v60_v25  ;;  %1655 = vmatprep.subr.mxu1 %v84_v26 }
  0xa5   :  { %1656 = vmatpush3.msra.mxu1 %v84_v26 }
  0xa6   :  { %1657 = vmatprep.subr.mxu1 %v83_v27 }
  0xa7   :  { %1658 = vmatpush3.msra.mxu1 %v83_v27 }
  0xa8   :  { %1659 = vmatprep.subr.mxu1 %v82_v28 }
  0xa9   :  { %1660 = vmatpush3.msra.mxu1 %v82_v28 }
  0xaa   :  { %1661 = vmatprep.subr.mxu1 %v81_v29 }
  0xab   :  { %1662 = vmatpush3.msra.mxu1 %v81_v29 }
  0xf0   :  { %v1953_v30 = vpop.f32.mrf.mxu0 }
  0xf2   :  { %v1955_v31 = vpop.f32.mrf.mxu0 }
  0xf4   :  { %v1957_v32 = vpop.f32.mrf.mxu0 }
  0xf6   :  { %v1959_v33 = vpop.f32.mrf.mxu0 }
  0xf8   :  { %v1961_v34 = vpop.f32.mrf.mxu0 }
  0xfa   :  { %v1963_v38 = vpop.f32.mrf.mxu0 }
  0xfc   :  { %v1965_v41 = vpop.f32.mrf.mxu0 }
  0xfe   :  { %v1971_v45 = vpop.f32.mrf.mxu0 }
 0x100   :  { %v1976_v51 = vpop.f32.mrf.mxu0 }
 0x102   :  { %v1982_v60 = vpop.f32.mrf.mxu0 }
 0x104   :  { %v1992_v6 = vpop.f32.mrf.mxu0 }
 0x105   :  { %2333 = vst [vmem:[#allocation14_spill] sm:$0xff] %v1992_v6 }
 0x106   :  { %v2002_v15 = vpop.f32.mrf.mxu0 }
 0x108   :  { %v2010_v23 = vpop.f32.mrf.mxu0 }
 0x109   :  { %2334 = vst [vmem:[#allocation15_spill] sm:$0xff] %v2010_v23 }
 0x10a   :  { %v2018_v36 = vpop.f32.mrf.mxu0 }
 0x10b   :  { %2335 = vst [vmem:[#allocation16_spill] sm:$0xff] %v2018_v36 }
 0x164   :  { %v1967_v42 = vpop.f32.mrf.mxu1 }
 0x165   :  { %2331 = vst [vmem:[#allocation12_spill] sm:$0xff] %v1967_v42  ;;  %v435_v0 = vrot.slane %v1967_v42, %v385_v43  ;;  %v428_v7 = vcombine.high %v1967_v42, %v1967_v42 }
 0x166   :  { %v1969_v44 = vpop.f32.mrf.mxu1 }
 0x167   :  { %2332 = vst [vmem:[#allocation13_spill] sm:$0xff] %v1969_v44  ;;  %v379_v46 = vcombine.high %v1969_v44, %v1969_v44  ;;  %v386_v47 = vrot.slane %v1969_v44, %v385_v43  ;;  %v443_v8 = vcombine.high %v435_v0, %v435_v0  ;;  %v451_v12 = vrot.slane %v435_v0, %v385_v43 }
 0x168   :  { %v442_v16 = vrot.slane %v428_v7, %v385_v43 }
 0x169   :  { %v393_v48 = vrot.slane %v379_v46, %v385_v43  ;;  %v394_v49 = vcombine.high %v386_v47, %v386_v47  ;;  %v402_v50 = vrot.slane %v386_v47, %v385_v43  ;;  %v465_v17 = vrot.slane %v443_v8, %v385_v43 }
 0x16a   :  { %v512_v20 = vrot.slane %v451_v12, %v1978_v52  ;;  %v473_v21 = vcombine.high %v451_v12, %v451_v12  ;;  %v444_v24 = vcombine.high %v442_v16, %v442_v16  ;;  %v458_v29 = vrot.slane %v442_v16, %v385_v43 }
 0x16b   :  { %v416_v53 = vrot.slane %v394_v49, %v385_v43  ;;  %v424_v54 = vcombine.high %v402_v50, %v402_v50  ;;  %v395_v55 = vcombine.high %v393_v48, %v393_v48  ;;  %v480_v56 = vrot.slane %v402_v50, %v1978_v52  ;;  %v2026_v49 = vpop.f32.mrf.mxu0 }
 0x16c   :  { %v409_v57 = vrot.slane %v393_v48, %v385_v43  ;;  %v475_v25 = vcombine.high %v465_v17, %v465_v17  ;;  %v516_v27 = vrot.slane %v465_v17, %v1978_v52  ;;  %v520_v28 = vrot.slane %v473_v21, %v1978_v52  ;;  %2336 = vst [vmem:[#allocation17_spill] sm:$0xff] %v2026_v49 }
 0x16d   :  { %v426_v58 = vcombine.high %v416_v53, %v416_v53  ;;  %v484_v59 = vrot.slane %v416_v53, %v1978_v52  ;;  %v557_v62 = vmul.f32 %v480_v56, %v1955_v31  ;;  %v488_v63 = vrot.slane %v424_v54, %v1978_v52  ;;  %v2034_v56 = vpop.f32.mrf.mxu0 }
 0x16e   :  { %v423_v1 = vrot.slane %v395_v55, %v385_v43  ;;  %v425_v3 = vcombine.high %v409_v57, %v409_v57  ;;  %v496_v5 = vrot.slane %v409_v57, %v1978_v52  ;;  %v565_v35 = vmul.f32 %v512_v20, %v1982_v60  ;;  %2337 = vst [vmem:[#allocation18_spill] sm:$0xff] %v2034_v56 }
 0x16f   :  { %v558_v61 = vmul.f32 %v1953_v30, %v484_v59  ;;  %v492_v2 = vrot.slane %v426_v58, %v1978_v52  ;;  %1663 = vmatprep.mubr.msk.f32.mxu1 %vm86_vm0, %v557_v62  ;;  %v559_v4 = vmul.f32 %v488_v63, %v1959_v33  ;;  %v472_v37 = vrot.slane %v444_v24, %v385_v43 }
 0x170   :  { %v500_v10 = vrot.slane %v423_v1, %v1978_v52  ;;  %v427_v11 = vcombine.high %v423_v1, %v423_v1  ;;  %v561_v13 = vmul.f32 %v496_v5, %v1963_v38  ;;  %v504_v14 = vrot.slane %v425_v3, %v1978_v52 }
 0x171   :  { %1664 = vmatmul.mubr.msk.f32.vlgmr.msra.gmra.mxu1 %vm86_vm0, %v558_v61  ;;  %v560_v9 = vmul.f32 %v1957_v32, %v492_v2  ;;  %v566_v39 = vmul.f32 %v1976_v51, %v516_v27  ;;  %v524_v40 = vrot.slane %v475_v25, %v1978_v52  ;;  %v567_v46 = vmul.f32 %v520_v28, %v2002_v15 }
 0x172   :  { %1666 = vmatprep.mubr.msk.f32.mxu1 %vm86_vm0, %v559_v4  ;;  %v562_v18 = vmul.f32 %v1961_v34, %v500_v10  ;;  %v508_v19 = vrot.slane %v427_v11, %v1978_v52  ;;  %v563_v22 = vmul.f32 %v504_v14, %v1971_v45  ;;  %v528_v47 = vrot.slane %v458_v29, %v1978_v52 }
 0x173   :  { %v474_v48 = vcombine.high %v458_v29, %v458_v29  ;;  %v532_v50 = vrot.slane %v472_v37, %v1978_v52  ;;  %v476_v53 = vcombine.high %v472_v37, %v472_v37  ;;  %v568_v43 = vmul.f32 %v1992_v6, %v524_v40 }
 0x174   :  { %v564_v26 = vmul.f32 %v1965_v41, %v508_v19  ;;  %v569_v54 = vmul.f32 %v528_v47, %v2018_v36 }
 0x175   :  { %1667 = vmatmul.mubr.msk.f32.gmra.mxu1 %vm86_vm0, %v560_v9  ;;  %v536_v55 = vrot.slane %v474_v48, %v1978_v52  ;;  %v570_v57 = vmul.f32 %v2010_v23, %v532_v50  ;;  %v540_v58 = vrot.slane %v476_v53, %v1978_v52 }
 0x176   :  { %1669 = vmatprep.mubr.msk.f32.mxu1 %vm86_vm0, %v561_v13 }
 0x177   :  { %v571_v59 = vmul.f32 %v536_v55, %v2034_v56  ;;  %v572_v61 = vmul.f32 %v2026_v49, %v540_v58 }
 0x179   :  { %1670 = vmatmul.mubr.msk.f32.gmra.mxu1 %vm86_vm0, %v562_v18 }
 0x17a   :  { %1672 = vmatprep.mubr.msk.f32.mxu1 %vm86_vm0, %v563_v22 }
 0x17d   :  { %1673 = vmatmul.mubr.msk.f32.gmra.mxu1 %vm86_vm0, %v564_v26 }
 0x17e   :  { %1675 = vmatprep.mubr.msk.f32.mxu1 %vm86_vm0, %v565_v35 }
 0x181   :  { %1676 = vmatmul.mubr.msk.f32.gmra.mxu1 %vm86_vm0, %v566_v39 }
 0x182   :  { %1678 = vmatprep.mubr.msk.f32.mxu1 %vm86_vm0, %v567_v46 }
 0x185   :  { %1679 = vmatmul.mubr.msk.f32.gmra.mxu1 %vm86_vm0, %v568_v43 }
 0x186   :  { %1681 = vmatprep.mubr.msk.f32.mxu1 %vm86_vm0, %v569_v54 }
 0x189   :  { %1682 = vmatmul.mubr.msk.f32.gmra.mxu1 %vm86_vm0, %v570_v57 }
 0x18a   :  { %1684 = vmatprep.mubr.msk.f32.mxu1 %vm86_vm0, %v571_v59 }
 0x18d   :  { %1685 = vmatmul.mubr.msk.f32.gmra.mxu1 %vm86_vm0, %v572_v61 }
 0x231   :  { %v1665_v62 = vpop.f32.mrf.mxu1 }
 0x232   :  { %v774_v63 = vsel %vm766_vm1, %v1665_v62, -inf }
 0x233   :  { %v775_v0 = vrot.slane %v774_v63, 4  ;;  %v687_v1 = vpop.f32.mrf.mxu1 }
 0x234   :  { %v767_v2 = vsel %vm766_vm1, %v687_v1, -inf }
 0x235   :  { %v776_v3 = vmax.f32 %v774_v63, %v775_v0  ;;  %v768_v52 = vrot.slane %v767_v2, 4  ;;  %v1668_v4 = vpop.f32.mrf.mxu1 }
 0x236   :  { %v788_v5 = vsel %vm766_vm1, %v1668_v4, -inf }
 0x237   :  { %v777_v7 = vrot.slane %v776_v3, 2  ;;  %v769_v8 = vmax.f32 %v767_v2, %v768_v52  ;;  %v789_v9 = vrot.slane %v788_v5, 4  ;;  %v697_v10 = vpop.f32.mrf.mxu1 }
 0x238   :  { %v781_v11 = vsel %vm766_vm1, %v697_v10, -inf }
 0x239   :  { %v778_v12 = vmax.f32 %v776_v3, %v777_v7  ;;  %v770_v13 = vrot.slane %v769_v8, 2  ;;  %v790_v14 = vmax.f32 %v788_v5, %v789_v9  ;;  %v782_v16 = vrot.slane %v781_v11, 4  ;;  %v2049_v17 = vpop.f32.mrf.mxu1 }
 0x23a   :  { %v802_v18 = vsel %vm766_vm1, %v2049_v17, -inf }
 0x23b   :  { %v779_v19 = vrot.slane %v778_v12, 1  ;;  %v771_v20 = vmax.f32 %v769_v8, %v770_v13  ;;  %v791_v21 = vrot.slane %v790_v14, 2  ;;  %v783_v22 = vmax.f32 %v781_v11, %v782_v16  ;;  %v2053_v24 = vpop.f32.mrf.mxu1 }
 0x23c   :  { %v803_v25 = vrot.slane %v802_v18, 4  ;;  %v795_v26 = vsel %vm766_vm1, %v2053_v24, -inf }
 0x23d   :  { %v780_v27 = vmax.f32 %v778_v12, %v779_v19  ;;  %v772_v28 = vrot.slane %v771_v20, 1  ;;  %v792_v29 = vmax.f32 %v790_v14, %v791_v21  ;;  %v784_v35 = vrot.slane %v783_v22, 2  ;;  %v2057_v37 = vpop.f32.mrf.mxu1 }
 0x23e   :  { %v804_v39 = vmax.f32 %v802_v18, %v803_v25  ;;  %v796_v40 = vrot.slane %v795_v26, 4  ;;  %v816_v46 = vsel %vm766_vm1, %v2057_v37, -inf }
 0x23f   :  { %v880_v47 = vsub.f32 %v1665_v62, %v780_v27  ;;  %v773_v48 = vmax.f32 %v771_v20, %v772_v28  ;;  %v793_v50 = vrot.slane %v792_v29, 1  ;;  %v785_v53 = vmax.f32 %v783_v22, %v784_v35  ;;  %v2061_v43 = vpop.f32.mrf.mxu1 }
 0x240   :  { %v805_v54 = vrot.slane %v804_v39, 2  ;;  %v797_v55 = vmax.f32 %v795_v26, %v796_v40  ;;  %v817_v57 = vrot.slane %v816_v46, 4  ;;  %v809_v58 = vsel %vm766_vm1, %v2061_v43, -inf }
 0x241   :  { %v897_v59 = vmul.f32 1.442695, %v880_v47  ;;  %v879_v61 = vsub.f32 %v687_v1, %v773_v48  ;;  %v794_v63 = vmax.f32 %v792_v29, %v793_v50  ;;  %v786_v0 = vrot.slane %v785_v53, 1  ;;  %v2065_v2 = vpop.f32.mrf.mxu1 }
 0x242   :  { %v806_v3 = vmax.f32 %v804_v39, %v805_v54  ;;  %v798_v52 = vrot.slane %v797_v55, 2  ;;  %v818_v62 = vmax.f32 %v816_v46, %v817_v57  ;;  %v810_v5 = vrot.slane %v809_v58, 4 }
 0x243   :  { %1721 = vpow2.f32 %v897_v59  ;;  %v895_v7 = vmul.f32 1.442695, %v879_v61  ;;  %v882_v8 = vsub.f32 %v1668_v4, %v794_v63  ;;  %v787_v9 = vmax.f32 %v785_v53, %v786_v0  ;;  %v2067_v11 = vpop.f32.mrf.mxu1 }
 0x244   :  { %v807_v12 = vrot.slane %v806_v3, 1  ;;  %v799_v13 = vmax.f32 %v797_v55, %v798_v52  ;;  %v819_v14 = vrot.slane %v818_v62, 2  ;;  %v811_v16 = vmax.f32 %v809_v58, %v810_v5 }
 0x245   :  { %1723 = vpow2.f32 %v895_v7  ;;  %v901_v1 = vmul.f32 1.442695, %v882_v8  ;;  %v881_v18 = vsub.f32 %v697_v10, %v787_v9  ;;  %v830_v19 = vsel %vm766_vm1, %v2065_v2, -inf  ;;  %v2071_v20 = vpop.f32.mrf.mxu1 }
 0x246   :  { %v808_v21 = vmax.f32 %v806_v3, %v807_v12  ;;  %v800_v22 = vrot.slane %v799_v13, 1  ;;  %v820_v25 = vmax.f32 %v818_v62, %v819_v14  ;;  %v812_v26 = vrot.slane %v811_v16, 2 }
 0x247   :  { %1725 = vpow2.f32 %v901_v1  ;;  %v899_v4 = vmul.f32 1.442695, %v881_v18  ;;  %v831_v27 = vrot.slane %v830_v19, 4  ;;  %v823_v28 = vsel %vm766_vm1, %v2067_v11, -inf  ;;  %v2075_v29 = vpop.f32.mrf.mxu1 }
 0x248   :  { %v884_v35 = vsub.f32 %v2049_v17, %v808_v21  ;;  %v801_v10 = vmax.f32 %v799_v13, %v800_v22  ;;  %v821_v39 = vrot.slane %v820_v25, 1  ;;  %v813_v40 = vmax.f32 %v811_v16, %v812_v26 }
 0x249   :  { %1727 = vpow2.f32 %v899_v4  ;;  %v832_v46 = vmax.f32 %v830_v19, %v831_v27  ;;  %v824_v47 = vrot.slane %v823_v28, 4  ;;  %v844_v48 = vsel %vm766_vm1, %v2071_v20, -inf  ;;  %v2083_v61 = vpop.f32.mrf.mxu1 }
 0x24a   :  { %v905_v50 = vmul.f32 1.442695, %v884_v35  ;;  %v883_v53 = vsub.f32 %v2053_v24, %v801_v10  ;;  %v822_v54 = vmax.f32 %v820_v25, %v821_v39  ;;  %v814_v55 = vrot.slane %v813_v40, 1 }
 0x24b   :  { %v833_v57 = vrot.slane %v832_v46, 2  ;;  %v825_v58 = vmax.f32 %v823_v28, %v824_v47  ;;  %v845_v59 = vrot.slane %v844_v48, 4  ;;  %v837_v17 = vsel %vm766_vm1, %v2075_v29, -inf }
 0x24c   :  { %1729 = vpow2.f32 %v905_v50  ;;  %v903_v63 = vmul.f32 1.442695, %v883_v53  ;;  %v886_v0 = vsub.f32 %v2057_v37, %v822_v54  ;;  %v815_v3 = vmax.f32 %v813_v40, %v814_v55 }
 0x24d   :  { %v834_v52 = vmax.f32 %v832_v46, %v833_v57  ;;  %v826_v62 = vrot.slane %v825_v58, 2  ;;  %v846_v5 = vmax.f32 %v844_v48, %v845_v59  ;;  %v838_v7 = vrot.slane %v837_v17, 4  ;;  %v1297_v59 = vpop.permute.xlu1 %1296 }
 0x24e   :  { %1731 = vpow2.f32 %v903_v63  ;;  %v909_v24 = vmul.f32 1.442695, %v886_v0  ;;  %v885_v8 = vsub.f32 %v2061_v43, %v815_v3  ;;  %v858_v9 = vsel %vm766_vm1, %v2083_v61, -inf }
 0x24f   :  { %v835_v12 = vrot.slane %v834_v52, 1  ;;  %v827_v13 = vmax.f32 %v825_v58, %v826_v62  ;;  %v847_v14 = vrot.slane %v846_v5, 2  ;;  %v839_v16 = vmax.f32 %v837_v17, %v838_v7  ;;  %v1299_v58 = vpop.permute.xlu0 %1298 }
 0x250   :  { %v2089_v1 = vpop.eup %1721  ;;  %1733 = vpow2.f32 %v909_v24  ;;  %v907_v37 = vmul.f32 1.442695, %v885_v8  ;;  %v859_v18 = vrot.slane %v858_v9, 4  ;;  %1687 = vmatprep.subr.mxu0 %v1299_v58 }
 0x251   :  { %v934_v19 = vsel %vm766_vm1, %v2089_v1, 0.0  ;;  %v836_v21 = vmax.f32 %v834_v52, %v835_v12  ;;  %v828_v22 = vrot.slane %v827_v13, 1  ;;  %v848_v25 = vmax.f32 %v846_v5, %v847_v14  ;;  %1688 = vmatpush3.msra.mxu0 %v1299_v58 }
 0x252   :  { %v2093_v26 = vpop.eup %1723  ;;  %v935_v43 = vrot.slane %v934_v19, 4  ;;  %1735 = vpow2.f32 %v907_v37  ;;  %v840_v4 = vrot.slane %v839_v16, 2  ;;  %v860_v27 = vmax.f32 %v858_v9, %v859_v18  ;;  %1689 = vmatprep.subr.mxu0 %v1297_v59 }
 0x253   :  { %v927_v28 = vsel %vm766_vm1, %v2093_v26, 0.0  ;;  %v888_v35 = vsub.f32 %v2065_v2, %v836_v21  ;;  %v829_v10 = vmax.f32 %v827_v13, %v828_v22  ;;  %v849_v39 = vrot.slane %v848_v25, 1  ;;  %1690 = vmatpush3.msra.mxu0 %v1297_v59 }
 0x254   :  { %v2098_v40 = vpop.eup %1725  ;;  %v936_v46 = vadd.f32 %v935_v43, %v934_v19  ;;  %v928_v47 = vrot.slane %v927_v28, 4  ;;  %v841_v48 = vmax.f32 %v839_v16, %v840_v4  ;;  %v861_v50 = vrot.slane %v860_v27, 2  ;;  %v1295_v16 = vpop.permute.xlu0 %1294 }
 0x255   :  { %v948_v53 = vsel %vm766_vm1, %v2098_v40, 0.0  ;;  %v913_v54 = vmul.f32 1.442695, %v888_v35  ;;  %v887_v55 = vsub.f32 %v2067_v11, %v829_v10  ;;  %v850_v57 = vmax.f32 %v848_v25, %v849_v39  ;;  %1691 = vmatprep.subr.mxu0 %v1295_v16 }
 0x256   :  { %v2103_v17 = vpop.eup %1727  ;;  %v937_v2 = vrot.slane %v936_v46, 2  ;;  %v929_v63 = vadd.f32 %v928_v47, %v927_v28  ;;  %v949_v0 = vrot.slane %v948_v53, 4  ;;  %v842_v3 = vrot.slane %v841_v48, 1  ;;  %1692 = vmatpush3.msra.mxu0 %v1295_v16 }
 0x257   :  { %v941_v52 = vsel %vm766_vm1, %v2103_v17, 0.0  ;;  %1737 = vpow2.f32 %v913_v54  ;;  %v911_v62 = vmul.f32 1.442695, %v887_v55  ;;  %v890_v5 = vsub.f32 %v2071_v20, %v850_v57 }
 0x258   :  { %v938_v7 = vadd.f32 %v937_v2, %v936_v46  ;;  %v930_v11 = vrot.slane %v929_v63, 2  ;;  %v950_v24 = vadd.f32 %v949_v0, %v948_v53  ;;  %v942_v8 = vrot.slane %v941_v52, 4 }
 0x259   :  { %v2108_v9 = vpop.eup %1729  ;;  %1739 = vpow2.f32 %v911_v62  ;;  %v917_v12 = vmul.f32 1.442695, %v890_v5  ;;  %v843_v13 = vmax.f32 %v841_v48, %v842_v3  ;;  %v862_v14 = vmax.f32 %v860_v27, %v861_v50  ;;  %v2121_v50 = vpop.f32.mrf.mxu1 }
 0x25a   :  { %v939_v37 = vrot.slane %v938_v7, 1  ;;  %v931_v18 = vadd.f32 %v930_v11, %v929_v63  ;;  %v951_v19 = vrot.slane %v950_v24, 2  ;;  %v943_v21 = vadd.f32 %v942_v8, %v941_v52 }
 0x25b   :  { %v2110_v20 = vpop.eup %1731  ;;  %v962_v22 = vsel %vm766_vm1, %v2108_v9, 0.0  ;;  %1741 = vpow2.f32 %v917_v12  ;;  %v889_v25 = vsub.f32 %v2075_v29, %v843_v13  ;;  %v863_v43 = vrot.slane %v862_v14, 1 }
 0x25c   :  { %v2115_v4 = vadd.f32 %v939_v37, %v938_v7  ;;  %v932_v27 = vrot.slane %v931_v18, 1  ;;  %v952_v28 = vadd.f32 %v951_v19, %v950_v24  ;;  %v944_v35 = vrot.slane %v943_v21, 2 }
 0x25d   :  { %v2117_v10 = vpop.eup %1733  ;;  %v963_v39 = vrot.slane %v962_v22, 4  ;;  %v955_v46 = vsel %vm766_vm1, %v2110_v20, 0.0  ;;  %v915_v47 = vmul.f32 1.442695, %v889_v25  ;;  %v864_v48 = vmax.f32 %v862_v14, %v863_v43 }
 0x25e   :  { %1743 = vrcp.f32 %v2115_v4  ;;  %v933_v29 = vadd.f32 %v932_v27, %v931_v18  ;;  %v953_v53 = vrot.slane %v952_v28, 1  ;;  %v945_v54 = vadd.f32 %v944_v35, %v943_v21 }
 0x25f   :  { %v2124_v55 = vpop.eup %1735  ;;  %v964_v57 = vadd.f32 %v963_v39, %v962_v22  ;;  %v956_v58 = vrot.slane %v955_v46, 4  ;;  %1745 = vpow2.f32 %v915_v47  ;;  %v851_v63 = vsel %vm766_vm1, %v2121_v50, -inf  ;;  %v2148_v47 = vpop.f32.mrf.mxu1 }
 0x260   :  { %1747 = vrcp.f32 %v933_v29  ;;  %v2126_v59 = vadd.f32 %v953_v53, %v952_v28  ;;  %v946_v2 = vrot.slane %v945_v54, 1  ;;  %v969_v52 = vsel %vm766_vm1, %v2124_v55, 0.0 }
 0x261   :  { %v965_v0 = vrot.slane %v964_v57, 2  ;;  %v957_v3 = vadd.f32 %v956_v58, %v955_v46  ;;  %v892_v62 = vsub.f32 %v2083_v61, %v864_v48  ;;  %v970_v7 = vrot.slane %v969_v52, 4 }
 0x262   :  { %1749 = vrcp.f32 %v2126_v59  ;;  %v947_v5 = vadd.f32 %v946_v2, %v945_v54  ;;  %v852_v12 = vrot.slane %v851_v63, 4  ;;  %v976_v18 = vsel %vm766_vm1, %v2117_v10, 0.0 }
 0x263   :  { %v966_v11 = vadd.f32 %v965_v0, %v964_v57  ;;  %v958_v24 = vrot.slane %v957_v3, 2  ;;  %v921_v8 = vmul.f32 1.442695, %v892_v62  ;;  %v971_v14 = vadd.f32 %v970_v7, %v969_v52 }
 0x264   :  { %v2134_v13 = vpop.eup %1737  ;;  %1751 = vrcp.f32 %v947_v5  ;;  %v853_v25 = vmax.f32 %v851_v63, %v852_v12  ;;  %v977_v53 = vrot.slane %v976_v18, 4  ;;  %v872_v0 = vsel %vm766_vm1, %v2148_v47, -inf }
 0x265   :  { %v967_v16 = vrot.slane %v966_v11, 1  ;;  %v959_v37 = vadd.f32 %v958_v24, %v957_v3  ;;  %v990_v61 = vsel %vm766_vm1, %v2134_v13, 0.0  ;;  %v972_v21 = vrot.slane %v971_v14, 2 }
 0x266   :  { %v2140_v19 = vpop.eup %1739  ;;  %v991_v22 = vrot.slane %v990_v61, 4  ;;  %1753 = vpow2.f32 %v921_v8  ;;  %v854_v57 = vrot.slane %v853_v25, 2  ;;  %v978_v8 = vadd.f32 %v977_v53, %v976_v18 }
 0x267   :  { %v2142_v43 = vadd.f32 %v967_v16, %v966_v11  ;;  %v960_v27 = vrot.slane %v959_v37, 1  ;;  %v983_v28 = vsel %vm766_vm1, %v2140_v19, 0.0  ;;  %v973_v39 = vadd.f32 %v972_v21, %v971_v14 }
 0x268   :  { %v2146_v35 = vpop.eup %1741  ;;  %v992_v46 = vadd.f32 %v991_v22, %v990_v61  ;;  %v984_v54 = vrot.slane %v983_v28, 4  ;;  %v855_v63 = vmax.f32 %v853_v25, %v854_v57  ;;  %v873_v25 = vrot.slane %v872_v0, 4 }
 0x269   :  { %2338 = vst [vmem:[#allocation19_spill] sm:$0xff] %v2146_v35  ;;  %v961_v48 = vadd.f32 %v960_v27, %v959_v37  ;;  %1755 = vrcp.f32 %v2142_v43  ;;  %v974_v58 = vrot.slane %v973_v39, 1  ;;  %v1004_v11 = vsel %vm766_vm1, %v2146_v35, 0.0 }
 0x26a   :  { %v993_v7 = vrot.slane %v992_v46, 2  ;;  %v985_v12 = vadd.f32 %v984_v54, %v983_v28  ;;  %v856_v61 = vrot.slane %v855_v63, 1  ;;  %v1005_v22 = vrot.slane %v1004_v11, 4 }
 0x26b   :  { %v1744_v2 = vpop.eup %1743  ;;  %1757 = vrcp.f32 %v961_v48  ;;  %v2156_v62 = vadd.f32 %v974_v58, %v973_v39  ;;  %v979_v58 = vrot.slane %v978_v8, 2  ;;  %v874_v23 = vmax.f32 %v872_v0, %v873_v25  ;;  %v2171_v0 = vpop.f32.mrf.mxu1 }
 0x26c   :  { %v2153_v3 = vpop.eup %1745  ;;  %v1056_v52 = vmul.f32 %v1744_v2, %v2115_v4  ;;  %v994_v39 = vadd.f32 %v993_v7, %v992_v46  ;;  %v986_v44 = vrot.slane %v985_v12, 2  ;;  %v857_v54 = vmax.f32 %v855_v63, %v856_v61 }
 0x26d   :  { %v1748_v24 = vpop.eup %1747  ;;  %v997_v14 = vsel %vm766_vm1, %v2153_v3, 0.0  ;;  %1759 = vrcp.f32 %v2156_v62  ;;  %v980_v46 = vadd.f32 %v979_v58, %v978_v8  ;;  %v865_v25 = vsel %vm766_vm1, %v2171_v0, -inf }
 0x26e   :  { %v1072_v16 = vsub.f32 2.0, %v1056_v52  ;;  %v1055_v37 = vmul.f32 %v1748_v24, %v933_v29  ;;  %v998_v4 = vrot.slane %v997_v14, 4  ;;  %v1006_v52 = vadd.f32 %v1005_v22, %v1004_v11 }
 0x26f   :  { %v1750_v21 = vpop.eup %1749  ;;  %v995_v6 = vrot.slane %v994_v39, 1  ;;  %v987_v7 = vadd.f32 %v986_v44, %v985_v12  ;;  %v875_v11 = vrot.slane %v874_v23, 2  ;;  %v981_v12 = vrot.slane %v980_v46, 1 }
 0x270   :  { %v1071_v27 = vsub.f32 2.0, %v1055_v37  ;;  %v999_v56 = vadd.f32 %v998_v4, %v997_v14  ;;  %v1088_v18 = vmul.f32 %v1744_v2, %v1072_v16  ;;  %v1058_v29 = vmul.f32 %v1750_v21, %v2126_v59 }
 0x271   :  { %v1752_v57 = vpop.eup %1751  ;;  %v891_v2 = vsub.f32 %v2121_v50, %v857_v54  ;;  %v1007_v59 = vrot.slane %v1006_v52, 2  ;;  %v2175_v44 = vadd.f32 %v995_v6, %v994_v39  ;;  %v988_v50 = vrot.slane %v987_v7, 1 }
 0x272   :  { %v1087_v28 = vmul.f32 %v1748_v24, %v1071_v27  ;;  %v1057_v53 = vmul.f32 %v1752_v57, %v947_v5  ;;  %v1000_v37 = vrot.slane %v999_v56, 2  ;;  %v1104_v35 = vmul.f32 %v2089_v1, %v1088_v18 }
 0x273   :  { %v2163_v49 = vpop.eup %1753  ;;  %v1074_v24 = vsub.f32 2.0, %v1058_v29  ;;  %v919_v4 = vmul.f32 1.442695, %v891_v2  ;;  %1761 = vrcp.f32 %v2175_v44  ;;  %v2186_v18 = vadd.f32 %v988_v50, %v987_v7 }
 0x274   :  { %v1103_v42 = vmul.f32 %v2093_v26, %v1087_v28  ;;  %v1073_v36 = vsub.f32 2.0, %v1057_v53  ;;  %v1018_v5 = vsel %vm766_vm1, %v2163_v49, 0.0  ;;  %v1001_v1 = vadd.f32 %v1000_v37, %v999_v56 }
 0x275   :  { %v1019_v61 = vrot.slane %v1018_v5, 4  ;;  %v1120_v22 = vmul.f32 %v1953_v30, %v1104_v35  ;;  %1763 = vpow2.f32 %v919_v4  ;;  %v982_v54 = vadd.f32 %v981_v12, %v980_v46 }
 0x276   :  { %v1089_v14 = vmul.f32 %v1752_v57, %v1073_v36  ;;  %v1756_v63 = vpop.eup %1755  ;;  %v1119_v16 = vmul.f32 %v1103_v42, %v1955_v31  ;;  %v1090_v57 = vmul.f32 %v1750_v21, %v1074_v24  ;;  %v1008_v31 = vadd.f32 %v1007_v59, %v1006_v52 }
 0x277   :  { %v1060_v58 = vmul.f32 %v1756_v63, %v2142_v43  ;;  %v876_v42 = vmax.f32 %v874_v23, %v875_v11  ;;  %v1020_v35 = vadd.f32 %v1019_v61, %v1018_v5  ;;  %v1142_v39 = vsel %vm766_vm1, %v1120_v22, 0.0 }
 0x278   :  { %v1758_v26 = vpop.eup %1757  ;;  %v1105_v8 = vmul.f32 %v2103_v17, %v1089_v14  ;;  %v1135_v6 = vsel %vm766_vm1, %v1119_v16, 0.0  ;;  %v1002_v17 = vrot.slane %v1001_v1, 1  ;;  %v866_v43 = vrot.slane %v865_v25, 4 }
 0x279   :  { %v1059_v36 = vmul.f32 %v1758_v26, %v961_v48  ;;  %v877_v21 = vrot.slane %v876_v42, 1  ;;  %v1136_v28 = vrot.slane %v1135_v6, 4  ;;  %v1106_v23 = vmul.f32 %v2098_v40, %v1090_v57 }
 0x27a   :  { %v1760_v27 = vpop.eup %1759  ;;  %v1121_v56 = vmul.f32 %v1105_v8, %v1959_v33  ;;  %v1076_v53 = vsub.f32 2.0, %v1060_v58  ;;  %v2190_v29 = vadd.f32 %v1002_v17, %v1001_v1  ;;  %v867_v37 = vmax.f32 %v865_v25, %v866_v43 }
 0x27b   :  { %v1075_v48 = vsub.f32 2.0, %v1059_v36  ;;  %v1061_v30 = vmul.f32 %v1760_v27, %v2156_v62  ;;  %v878_v52 = vmax.f32 %v876_v42, %v877_v21  ;;  %v1021_v5 = vrot.slane %v1020_v35, 2 }
 0x27c   :  { %v1149_v33 = vsel %vm766_vm1, %v1121_v56, 0.0  ;;  %1765 = vrcp.f32 %v982_v54  ;;  %v1143_v2 = vrot.slane %v1142_v39, 4  ;;  %v868_v24 = vrot.slane %v867_v37, 2 }
 0x27d   :  { %v1091_v62 = vmul.f32 %v1758_v26, %v1075_v48  ;;  %v1077_v14 = vsub.f32 2.0, %v1061_v30  ;;  %v894_v7 = vsub.f32 %v2148_v47, %v878_v52  ;;  %v1122_v59 = vmul.f32 %v1957_v32, %v1106_v23 }
 0x27e   :  { %v1150_v11 = vrot.slane %v1149_v33, 4  ;;  %1767 = vrcp.f32 %v2186_v18  ;;  %v1009_v40 = vrot.slane %v1008_v31, 1  ;;  %v1137_v46 = vadd.f32 %v1136_v28, %v1135_v6 }
 0x27f   :  { %v1092_v16 = vmul.f32 %v1756_v63, %v1076_v53  ;;  %v925_v8 = vmul.f32 1.442695, %v894_v7  ;;  %v869_v1 = vmax.f32 %v867_v37, %v868_v24  ;;  %v1107_v36 = vmul.f32 %v2110_v20, %v1091_v62 }
 0x280   :  { %v1093_v26 = vmul.f32 %v1760_v27, %v1077_v14  ;;  %1769 = vrcp.f32 %v2190_v29  ;;  %v1022_v12 = vadd.f32 %v1021_v5, %v1020_v35  ;;  %v1144_v61 = vadd.f32 %v1143_v2, %v1142_v39  ;;  %v2201_v57 = vpop.eup %1761 }
 0x281   :  { %1771 = vpow2.f32 %v925_v8  ;;  %v870_v47 = vrot.slane %v869_v1, 1  ;;  %v2197_v22 = vadd.f32 %v1009_v40, %v1008_v31  ;;  %v1151_v32 = vadd.f32 %v1150_v11, %v1149_v33 }
 0x282   :  { %v1156_v50 = vsel %vm766_vm1, %v1122_v59, 0.0  ;;  %v1108_v4 = vmul.f32 %v2108_v9, %v1092_v16  ;;  %v1138_v63 = vrot.slane %v1137_v46, 2  ;;  %v1123_v20 = vmul.f32 %v1107_v36, %v1963_v38  ;;  %v2205_v6 = vpop.eup %1763 }
 0x283   :  { %v871_v25 = vmax.f32 %v869_v1, %v870_v47  ;;  %v1109_v27 = vmul.f32 %v2124_v55, %v1093_v26  ;;  %v1023_v58 = vrot.slane %v1022_v12, 1  ;;  %v1157_v42 = vrot.slane %v1156_v50, 4 }
 0x284   :  { %v1145_v56 = vrot.slane %v1144_v61, 2  ;;  %1773 = vrcp.f32 %v2197_v22  ;;  %v1011_v9 = vsel %vm766_vm1, %v2205_v6, 0.0  ;;  %v1152_v17 = vrot.slane %v1151_v32, 2 }
 0x285   :  { %v893_v31 = vsub.f32 %v2171_v0, %v871_v25  ;;  %v1012_v48 = vrot.slane %v1011_v9, 4  ;;  %v1124_v35 = vmul.f32 %v1961_v34, %v1108_v4  ;;  %v1139_v38 = vadd.f32 %v1138_v63, %v1137_v46 }
 0x286   :  { %v2212_v39 = vadd.f32 %v1023_v58, %v1022_v12  ;;  %v1125_v55 = vmul.f32 %v1109_v27, %v1971_v45  ;;  %v1158_v21 = vadd.f32 %v1157_v42, %v1156_v50  ;;  %v1163_v43 = vsel %vm766_vm1, %v1123_v20, 0.0 }
 0x287   :  { %v923_v30 = vmul.f32 1.442695, %v893_v31  ;;  %v2218_v28 = vmul.f32 %v2201_v57, %v2175_v44  ;;  %v1013_v23 = vadd.f32 %v1012_v48, %v1011_v9  ;;  %v1146_v53 = vadd.f32 %v1145_v56, %v1144_v61 }
 0x288   :  { %v1153_v52 = vadd.f32 %v1152_v17, %v1151_v32  ;;  %v1140_v62 = vrot.slane %v1139_v38, 1  ;;  %v1159_v14 = vrot.slane %v1158_v21, 2  ;;  %v1164_v45 = vrot.slane %v1163_v43, 4 }
 0x289   :  { %v1766_v0 = vpop.eup %1765  ;;  %1775 = vpow2.f32 %v923_v30  ;;  %v1014_v37 = vrot.slane %v1013_v23, 2  ;;  %v1170_v2 = vsel %vm766_vm1, %v1124_v35, 0.0  ;;  %v1177_v44 = vsel %vm766_vm1, %v1125_v55, 0.0 }
 0x28a   :  { %v1062_v33 = vmul.f32 %v1766_v0, %v982_v54  ;;  %1777 = vrcp.f32 %v2212_v39  ;;  %v1080_v54 = vsub.f32 2.0, %v2218_v28  ;;  %v1147_v59 = vrot.slane %v1146_v53, 1 }
 0x28b   :  { %v2220_v34 = vpop.eup %1767  ;;  %v1015_v24 = vadd.f32 %v1014_v37, %v1013_v23  ;;  %v1165_v11 = vadd.f32 %v1164_v45, %v1163_v43  ;;  %v1154_v16 = vrot.slane %v1153_v52, 1  ;;  %v1171_v8 = vrot.slane %v1170_v2, 4 }
 0x28c   :  { %v1078_v5 = vsub.f32 2.0, %v1062_v33  ;;  %v1178_v1 = vrot.slane %v1177_v44, 4  ;;  %v1063_v36 = vmul.f32 %v2220_v34, %v2186_v18  ;;  %v1160_v61 = vadd.f32 %v1159_v14, %v1158_v21 }
 0x28d   :  { %v2225_v7 = vpop.eup %1769  ;;  %v1016_v26 = vrot.slane %v1015_v24, 1  ;;  %v1141_v4 = vadd.f32 %v1140_v62, %v1139_v38  ;;  %v1148_v63 = vadd.f32 %v1147_v59, %v1146_v53  ;;  %v1166_v20 = vrot.slane %v1165_v11, 2 }
 0x28e   :  { %v2228_v40 = vpop.eup %1771  ;;  %v1094_v46 = vmul.f32 %v1766_v0, %v1078_v5  ;;  %v1065_v47 = vmul.f32 %v2225_v7, %v2190_v29  ;;  %v1172_v27 = vadd.f32 %v1171_v8, %v1170_v2  ;;  %v1155_v42 = vadd.f32 %v1154_v16, %v1153_v52 }
 0x28f   :  { %v1032_v12 = vsel %vm766_vm1, %v2228_v40, 0.0  ;;  %v2237_v25 = vadd.f32 %v1016_v26, %v1015_v24  ;;  %v1179_v31 = vadd.f32 %v1178_v1, %v1177_v44  ;;  %v1161_v9 = vrot.slane %v1160_v61, 1  ;;  %v1293_v24 = vpop.permute.xlu1 %1292 }
 0x290   :  { %v1033_v32 = vrot.slane %v1032_v12, 4  ;;  %v1110_v50 = vmul.f32 %v2117_v10, %v1094_v46  ;;  %v1167_v29 = vadd.f32 %v1166_v20, %v1165_v11  ;;  %v1173_v17 = vrot.slane %v1172_v27, 2  ;;  %1693 = vmatprep.subr.mxu0 %v1293_v24 }
 0x291   :  { %v1774_v56 = vpop.eup %1773  ;;  %1779 = vrcp.f32 %v2237_v25  ;;  %v1079_v48 = vsub.f32 2.0, %v1063_v36  ;;  %v1180_v30 = vrot.slane %v1179_v31, 2  ;;  %v1264_v43 = vsel %vm1263_vm2, %v1148_v63, %v1141_v4  ;;  %1694 = vmatpush3.msra.mxu0 %v1293_v24 }
 0x292   :  { %v1034_v58 = vadd.f32 %v1033_v32, %v1032_v12  ;;  %v1126_v18 = vmul.f32 %v1965_v41, %v1110_v50  ;;  %v1168_v38 = vrot.slane %v1167_v29, 1  ;;  %v1174_v55 = vadd.f32 %v1173_v17, %v1172_v27 }
 0x293   :  { %v1081_v41 = vsub.f32 2.0, %v1065_v47  ;;  %v1181_v23 = vadd.f32 %v1180_v30, %v1179_v31  ;;  %v1266_v53 = vsel %vm1265_vm3, %v1155_v42, %v1264_v43  ;;  %v1162_v52 = vadd.f32 %v1161_v9, %v1160_v61  ;;  %v2339_v30 = vld [vmem:[#allocation19_spill] sm:$0xff] }
 0x294   :  { %v1035_v10 = vrot.slane %v1034_v58, 2  ;;  %v1184_v35 = vsel %vm766_vm1, %v1126_v18, 0.0  ;;  %v1169_v37 = vadd.f32 %v1168_v38, %v1167_v29  ;;  %v1175_v62 = vrot.slane %v1174_v55, 1  ;;  %v1785_v38 = vld [vmem:[#allocation7 + $0x38] sm:$0xff] }
 0x295   :  { %v1185_v21 = vrot.slane %v1184_v35, 4  ;;  %v1066_v45 = vmul.f32 %v1774_v56, %v2197_v22  ;;  %v1182_v44 = vrot.slane %v1181_v23, 1  ;;  %v1268_v16 = vsel %vm1267_vm4, %v1162_v52, %v1266_v53 }
 0x296   :  { %v1036_v0 = vadd.f32 %v1035_v10, %v1034_v58  ;;  %v2244_v33 = vpop.eup %1775  ;;  %v1095_v8 = vmul.f32 %v2220_v34, %v1079_v48  ;;  %v1270_v36 = vsel %vm1269_vm5, %v1169_v37, %v1268_v16  ;;  %v1097_v22 = vmul.f32 %v2225_v7, %v1081_v41  ;;  %v2342_v37 = vld [vmem:[#allocation12_spill] sm:$0xff] }
 0x297   :  { %v1186_v14 = vadd.f32 %v1185_v21, %v1184_v35  ;;  %v1025_v2 = vsel %vm766_vm1, %v2244_v33, 0.0  ;;  %v1778_v59 = vpop.eup %1777  ;;  %v1183_v1 = vadd.f32 %v1182_v44, %v1181_v23  ;;  %v1176_v61 = vadd.f32 %v1175_v62, %v1174_v55  ;;  %v2340_v21 = vld [vmem:[#allocation14_spill] sm:$0xff]  ;;  %v2341_v23 = vld [vmem:[#allocation16_spill] sm:$0xff] }
 0x298   :  { %v1037_v5 = vrot.slane %v1036_v0, 1  ;;  %v1026_v11 = vrot.slane %v1025_v2, 4  ;;  %v1096_v32 = vmul.f32 %v2201_v57, %v1080_v54  ;;  %v1082_v50 = vsub.f32 2.0, %v1066_v45 }
 0x299   :  { %v1187_v46 = vrot.slane %v1186_v14, 2  ;;  %v1068_v4 = vmul.f32 %v1778_v59, %v2212_v39  ;;  %v1272_v20 = vsel %vm1271_vm6, %v1176_v61, %v1270_v36  ;;  %v1111_v27 = vmul.f32 %v2140_v19, %v1095_v8 }
 0x29a   :  { %v1038_v26 = vadd.f32 %v1037_v5, %v1036_v0  ;;  %v1027_v12 = vadd.f32 %v1026_v11, %v1025_v2  ;;  %v1274_v58 = vsel %vm1273_vm7, %v1183_v1, %v1272_v20  ;;  %v1113_v7 = vmul.f32 %v2153_v3, %v1097_v22 }
 0x29b   :  { %v1188_v47 = vadd.f32 %v1187_v46, %v1186_v14  ;;  %v1112_v57 = vmul.f32 %v2134_v13, %v1096_v32  ;;  %v1098_v54 = vmul.f32 %v1774_v56, %v1082_v50  ;;  %v1084_v31 = vsub.f32 2.0, %v1068_v4  ;;  %v1786_v46 = vld [vmem:[#allocation7 + $0x18] sm:$0xff] }
 0x29c   :  { %1781 = vrcp.f32 %v1038_v26  ;;  %v1028_v63 = vrot.slane %v1027_v12, 2  ;;  %v1127_v17 = vmul.f32 %v1111_v27, %v1982_v60  ;;  %v1129_v19 = vmul.f32 %v1113_v7, %v2002_v15 }
 0x29d   :  { %v1189_v34 = vrot.slane %v1188_v47, 1  ;;  %v1128_v10 = vmul.f32 %v1976_v51, %v1112_v57  ;;  %v1114_v13 = vmul.f32 %v2339_v30, %v1098_v54  ;;  %v1100_v56 = vmul.f32 %v1778_v59, %v1084_v31 }
 0x29e   :  { %v1029_v18 = vadd.f32 %v1028_v63, %v1027_v12  ;;  %v1780_v28 = vpop.eup %1779  ;;  %v1205_v60 = vsel %vm766_vm1, %v1129_v19, 0.0  ;;  %v2344_v12 = vld [vmem:[#allocation17_spill] sm:$0xff]  ;;  %v2345_v19 = vld [vmem:[#allocation18_spill] sm:$0xff] }
 0x29f   :  { %v1190_v42 = vadd.f32 %v1189_v34, %v1188_v47  ;;  %v1067_v39 = vmul.f32 %v1780_v28, %v2237_v25  ;;  %v1191_v25 = vsel %vm766_vm1, %v1127_v17, 0.0  ;;  %v1198_v15 = vsel %vm766_vm1, %v1128_v10, 0.0 }
 0x2a0   :  { %v1030_v9 = vrot.slane %v1029_v18, 1  ;;  %v1130_v43 = vmul.f32 %v2340_v21, %v1114_v13  ;;  %v1116_v51 = vmul.f32 %v2163_v49, %v1100_v56  ;;  %v1192_v0 = vrot.slane %v1191_v25, 4 }
 0x2a1   :  { %v1276_v29 = vsel %vm1275_vm8, %v1190_v42, %v1274_v58  ;;  %v1083_v3 = vsub.f32 2.0, %v1067_v39  ;;  %v1206_v52 = vrot.slane %v1205_v60, 4  ;;  %v1199_v14 = vrot.slane %v1198_v15, 4 }
 0x2a2   :  { %1284 = vrot.lane.b32.xlu0 %v1276_v29, %s1884_s2  ;;  %v1031_v48 = vadd.f32 %v1030_v9, %v1029_v18  ;;  %v1212_v44 = vsel %vm766_vm1, %v1130_v43, 0.0  ;;  %v1193_v24 = vadd.f32 %v1192_v0, %v1191_v25 }
 0x2a3   :  { %v1099_v35 = vmul.f32 %v1780_v28, %v1083_v3  ;;  %v1207_v49 = vadd.f32 %v1206_v52, %v1205_v60  ;;  %v1200_v16 = vadd.f32 %v1199_v14, %v1198_v15  ;;  %v1213_v8 = vrot.slane %v1212_v44, 4 }
 0x2a4   :  { %1783 = vrcp.f32 %v1031_v48 }
 0x2a5   :  { %v1115_v55 = vmul.f32 %v2205_v6, %v1099_v35  ;;  %v2343_v6 = vld [vmem:[#allocation15_spill] sm:$0xff]  ;;  %v1208_v47 = vrot.slane %v1207_v49, 2  ;;  %v1201_v4 = vrot.slane %v1200_v16, 2  ;;  %v1214_v63 = vadd.f32 %v1213_v8, %v1212_v44 }
 0x2a6   :  { %1405 = vrot.lane.b32.xlu0 %v1785_v38, %s1885_s7  ;;  %v1132_v2 = vmul.f32 %v2343_v6, %v1116_v51  ;;  %v1788_v8 = vld [vmem:[#allocation7 + $0x8] sm:$0xff] }
 0x2a7   :  { %v1131_v53 = vmul.f32 %v1115_v55, %v2341_v23  ;;  %v1209_v18 = vadd.f32 %v1208_v47, %v1207_v49  ;;  %v1202_v28 = vadd.f32 %v1201_v4, %v1200_v16  ;;  %v1215_v57 = vrot.slane %v1214_v63, 2  ;;  %v1787_v16 = vld [vmem:[#allocation7 + $0x28] sm:$0xff] }
 0x2a8   :  { %v1226_v36 = vsel %vm766_vm1, %v1132_v2, 0.0 }
 0x2a9   :  { %v1782_v41 = vpop.eup %1781  ;;  %v1219_v45 = vsel %vm766_vm1, %v1131_v53, 0.0  ;;  %v1227_v34 = vrot.slane %v1226_v36, 4  ;;  %v1210_v29 = vrot.slane %v1209_v18, 1  ;;  %v1216_v10 = vadd.f32 %v1215_v57, %v1214_v63  ;;  %v1551_v53 = vld [vmem:[%s2321_s3] ss:$0 sm:$0xff]  ;;  %s1886_s3 = smov [#allocation8]  }
 0x2aa   :  { %1306 = vrot.lane.b32.xlu0 %v2342_v37, %s1884_s2  ;;  %v1070_v62 = vmul.f32 %v1782_v41, %v1038_v26  ;;  %v1220_v11 = vrot.slane %v1219_v45, 4  ;;  %v1194_v26 = vrot.slane %v1193_v24, 2  ;;  %s1502_s10 = sshll.u32 %s1886_s3, 4  ;;  %s1503_s10 = int_to_ptr.vmem [resolvable:$true] %s1502_s10 }
 0x2ab   :  { %v1228_v54 = vadd.f32 %v1227_v34, %v1226_v36  ;;  %v1211_v25 = vadd.f32 %v1210_v29, %v1209_v18  ;;  %v1217_v15 = vrot.slane %v1216_v10, 1  ;;  %s1849_s11 = scalar_lea.vmem %s1503_s10, 256  ;;  %p1854_p2 = scmp.lt.s32.totalorder %s1503_s10, %s1503_s10 }
 0x2ac   :  { %v1086_v5 = vsub.f32 2.0, %v1070_v62  ;;  %v1221_v32 = vadd.f32 %v1220_v11, %v1219_v45  ;;  %v1195_v58 = vadd.f32 %v1194_v26, %v1193_v24  ;;  %p1850_p1 = scmp.ne.s32.totalorder %s1503_s10, %s1849_s11  ;;  %p1855_p3 = scmp.lt.s32.totalorder %s1849_s11, %s1849_s11 }
 0x2ad   :  { %v1229_v30 = vrot.slane %v1228_v54, 2  ;;  %v1218_v52 = vadd.f32 %v1217_v15, %v1216_v10 }
 0x2ae   :  { %v1102_v59 = vmul.f32 %v1782_v41, %v1086_v5  ;;  %1401 = vrot.lane.b32.xlu0 %v1786_v46, %s1885_s7  ;;  %v1222_v42 = vrot.slane %v1221_v32, 2  ;;  %v1196_v39 = vrot.slane %v1195_v58, 1  ;;  %v2346_v46 = vld [vmem:[#allocation13_spill] sm:$0xff]  ;;  %p1856_p4 = por %p1855_p3, %p1854_p2 }
 0x2af   :  { %v1230_v21 = vadd.f32 %v1229_v30, %v1228_v54 }
 0x2b0   :  { %v1118_v1 = vmul.f32 %v2228_v40, %v1102_v59  ;;  %v1223_v17 = vadd.f32 %v1222_v42, %v1221_v32  ;;  %v1197_v13 = vadd.f32 %v1196_v39, %v1195_v58  ;;  %p1857_p5 = pnand %p1856_p4, %p1850_p1 }
 0x2b1   :  { %v1784_v22 = vpop.eup %1783  ;;  %v1231_v37 = vrot.slane %v1230_v21, 1 }
 0x2b2   :  { %v1134_v61 = vmul.f32 %v2344_v12, %v1118_v1  ;;  %v1069_v50 = vmul.f32 %v1784_v22, %v1031_v48  ;;  %v1203_v48 = vrot.slane %v1202_v28, 1  ;;  %v1224_v38 = vrot.slane %v1223_v17, 1  ;;  %1411 = vrot.lane.b32.xlu0 %v1551_v53, %s1884_s2 }
 0x2b3   :  { %v1232_v2 = vadd.f32 %v1231_v37, %v1230_v21 }
 0x2b4   :  { %v1240_v20 = vsel %vm766_vm1, %v1134_v61, 0.0  ;;  %v1085_v27 = vsub.f32 2.0, %v1069_v50  ;;  %v1204_v55 = vadd.f32 %v1203_v48, %v1202_v28  ;;  %v1225_v41 = vadd.f32 %v1224_v38, %v1223_v17 }
 0x2b5   :  { %v1241_v7 = vrot.slane %v1240_v20, 4 }
 0x2b6   :  { %v1101_v40 = vmul.f32 %v1784_v22, %v1085_v27  ;;  %v1277_v51 = vsel %vm1263_vm2, %v1204_v55, %v1197_v13 }
 0x2b7   :  { %v1242_v9 = vadd.f32 %v1241_v7, %v1240_v20  ;;  %v1278_v23 = vsel %vm1265_vm3, %v1211_v25, %v1277_v51 }
 0x2b8   :  { %v1117_v31 = vmul.f32 %v2244_v33, %v1101_v40  ;;  %v1279_v45 = vsel %vm1267_vm4, %v1218_v52, %v1278_v23 }
 0x2b9   :  { %v1243_v35 = vrot.slane %v1242_v9, 2  ;;  %v1280_v6 = vsel %vm1269_vm5, %v1225_v41, %v1279_v45 }
 0x2ba   :  { %v1133_v3 = vmul.f32 %v1117_v31, %v2345_v19  ;;  %v1281_v59 = vsel %vm1271_vm6, %v1232_v2, %v1280_v6 }
 0x2bb   :  { %v1244_v43 = vadd.f32 %v1243_v35, %v1242_v9 }
 0x2bc   :  { %v1233_v56 = vsel %vm766_vm1, %v1133_v3, 0.0 }
 0x2bd   :  { %v1234_v60 = vrot.slane %v1233_v56, 4  ;;  %v1245_v14 = vrot.slane %v1244_v43, 1 }
 0x2bf   :  { %v1235_v33 = vadd.f32 %v1234_v60, %v1233_v56  ;;  %v1246_v24 = vadd.f32 %v1245_v14, %v1244_v43 }
 0x2c1   :  { %v1236_v0 = vrot.slane %v1235_v33, 2 }
 0x2c3   :  { %v1237_v62 = vadd.f32 %v1236_v0, %v1235_v33 }
 0x2c5   :  { %v1238_v5 = vrot.slane %v1237_v62, 1 }
 0x2c7   :  { %v1239_v44 = vadd.f32 %v1238_v5, %v1237_v62 }
 0x2c9   :  { %v1282_v49 = vsel %vm1273_vm7, %v1239_v44, %v1281_v59 }
 0x2ca   :  { %v1283_v11 = vsel %vm1275_vm8, %v1246_v24, %v1282_v49 }
 0x2cb   :  { %1286 = vrot.lane.b32.xlu1 %v1283_v11, %s1884_s2 }
 0x2cf   :  { %1304 = vrot.lane.b32.xlu1 %v2346_v46, %s1884_s2 }
 0x2d3   :  { %1403 = vrot.lane.b32.xlu1 %v1787_v16, %s1885_s7 }
 0x2d7   :  { %1399 = vrot.lane.b32.xlu1 %v1788_v8, %s1885_s7 }
 0x314   :  { %v1285_v1 = vpop.permute.xlu0 %1284 }
 0x315   :  { %1695 = vmatprep.mubr.msk.f32.mxu0 %vm86_vm0, %v1285_v1 }
 0x318   :  { %v1406_v36 = vpop.permute.xlu0 %1405 }
 0x319   :  { %1698 = vmatprep.subr.mxu0 %v1406_v36 }
 0x31c   :  { %v1307_v12 = vpop.permute.xlu0 %1306 }
 0x320   :  { %v1402_v47 = vpop.permute.xlu0 %1401 }
 0x324   :  { %v1412_v18 = vpop.permute.xlu0 %1411 }
 0x33d   :  { %v1287_v26 = vpop.permute.xlu1 %1286 }
 0x33e   :  { %1696 = vmatmul.mubr.msk.f32.vlgmr.msra.gmra.mxu0 %vm86_vm0, %v1287_v26 }
 0x33f   :  { %1699 = vmatpush3.msra.mxu0 %v1406_v36 }
 0x341   :  { %v1305_v22 = vpop.permute.xlu1 %1304 }
 0x345   :  { %v1404_v61 = vpop.permute.xlu1 %1403 }
 0x346   :  { %1700 = vmatprep.subr.mxu0 %v1404_v61 }
 0x347   :  { %1701 = vmatpush3.msra.mxu0 %v1404_v61 }
 0x348   :  { %1702 = vmatprep.subr.mxu0 %v1402_v47 }
 0x349   :  { %1703 = vmatpush3.msra.mxu0 %v1402_v47  ;;  %v1400_v32 = vpop.permute.xlu1 %1399 }
 0x34a   :  { %1704 = vmatprep.subr.mxu0 %v1400_v32 }
 0x34b   :  { %1705 = vmatpush3.msra.mxu0 %v1400_v32 }
 0x3fe   :  { %v1697_v50 = vpop.f32.mrf.mxu0 }
 0x3ff   :  { %v1386_v4 = vadd.f32 %v1697_v50, %v1307_v12 }
 0x400   :  { %v1380_v63 = vpop.f32.mrf.mxu0 }
 0x401   :  { %v1381_v34 = vadd.f32 %v1380_v63, %v1305_v22  ;;  %v1396_v20 = vadd.f32 %v1551_v53, %v1386_v4 }
 0x403   :  { %v1395_v27 = vadd.f32 %v1551_v53, %v1381_v34  ;;  %v1398_v7 = vmax.f32 %v1396_v20, 0.0 }
 0x405   :  { %v1397_v58 = vmax.f32 %v1395_v27, 0.0 }
 0x407   :  { %1706 = vmatprep.mubr.msk.f32.mxu0 %vm86_vm0, %v1397_v58 }
 0x408   :  { %1707 = vmatmul.mubr.msk.f32.vlgmr.msra.gmra.mxu0 %vm86_vm0, %v1398_v7 }
 0x4c8   :  { %v1708_v42 = vpop.f32.mrf.mxu0 }
 0x4c9   :  { %v1492_v40 = vadd.f32 %v1708_v42, %v1412_v18 }
 0x4ca   :  { %v1486_v28 = vpop.f32.mrf.mxu0 }
 0x4cb   :  { %1496 = vst.msk [vmem:[#allocation8 + $0x8] sm:$0xff] %vm86_vm0, %v1492_v40  ;;  %v1487_v57 = vadd.f32 %v1486_v28, %v1412_v18 }
 0x4cd   :  { %1495 = vst.msk [vmem:[#allocation8] sm:$0xff] %vm86_vm0, %v1487_v57 }
 0x4ce   :  { %1860 = shalt.err (!%p1857_p5)
}
 0x4cf   :  { %1508 = dma.vmem_to_hbm [thread:$0]  %s1503_s10, 256, %s2322_s4, [#allocation4], %s1877_s20, %s1877_s20, %s1878_s21  }
 0x4d0   :  { %1873 = dma.done.wait [#allocation4], 256  }
 0x4d1   :  { %1874 = vsyncadd [#allocation4], 4294967040 }
 0x4d2   :  { %1512 = vsyncpa [#allocation3], 1 }
 0x4d3   :  { %1513 = vsyncpa [#allocation6], 1 }
 0x4d4   :  { %1514 = vsyncpa [#allocation4], 1 }

</bundles_post_ra>
